<compile_context>
chip_gen: v5e
topology: v5e:2x2
jax: 0.10.0
libtpu: 0.0.40
codegen_flags: <defaults>
</compile_context>

<pallas_src>
import jax
import jax.numpy as jnp
from jax.experimental import pallas as pl
from jax.experimental.pallas import tpu as pltpu


def _round_up(x: int, m: int) -> int:
    return ((x + m - 1) // m) * m


def _reward_mlp_kernel(s_ref, a_ref, w1s_ref, w1a_ref, b1_ref, w2_ref, b2_ref,
                       o_ref):
    # s:   [S, TB]    state^T batch tile (lane-dense along batch)
    # a:   [A, TB]    action^T batch tile
    # w1s: [Hp, S]    first-layer weight rows for state features   (resident)
    # w1a: [Hp, A]    first-layer weight rows for action features  (resident)
    # b1:  [Hp, 1]    first-layer bias column                      (resident)
    # w2:  [8, Hp]    second-layer weight row, replicated 8x       (resident)
    # b2:  [1, 1]     second-layer bias, scalar in SMEM
    # o:   [8, TB]    reward replicated over 8 sublanes (lane-dense store)
    h = jnp.dot(w1s_ref[...], s_ref[...], preferred_element_type=jnp.float32)
    h = h + jnp.dot(w1a_ref[...], a_ref[...], preferred_element_type=jnp.float32)
    h = jnp.maximum(h + b1_ref[...], 0.0)              # ReLU on VPU, [Hp, TB] f32
    # H -> 1 projection on the MXU (no XLU lane reduce); result is lane-dense.
    out = jnp.dot(w2_ref[...], h.astype(w2_ref.dtype),
                  preferred_element_type=jnp.float32)  # [8, TB]
    o_ref[...] = (out + b2_ref[0, 0]).astype(o_ref.dtype)


def irl_reward(state, action, w1, b1, w2, b2, *, tb_max=8192,
               compute_dtype=jnp.float32):
    """Pallas equivalent of IRLModel.forward(state, action).

    Weight layout (nn.Linear weights stored transposed, i.e. [in, out]):
      w1: [state_dim + action_dim, hidden_dim], b1: [hidden_dim] or [1, H]
      w2: [hidden_dim, 1],                       b2: scalar-shaped
    """
    state = jnp.asarray(state, jnp.float32)
    action = jnp.asarray(action, jnp.float32)
    B, S = state.shape
    A = action.shape[1]
    H = w1.shape[1]

    w1 = jnp.asarray(w1, jnp.float32)
    b1 = jnp.asarray(b1, jnp.float32).reshape(H, 1)
    w2 = jnp.asarray(w2, jnp.float32).reshape(1, H)
    b2 = jnp.asarray(b2, jnp.float32).reshape(1, 1)

    # Pad hidden dim to a full 128-lane/sublane multiple; zero rows/cols are
    # inert through ReLU and the second matmul (tiny one-off XLA ops on the
    # small weights only).
    Hp = _round_up(max(H, 128), 128)

    # Feature-major weights, split by input rows (no concat):
    w1_t = jnp.pad(jnp.transpose(w1), ((0, Hp - H), (0, 0)))     # [Hp, S+A]
    w1s_t = w1_t[:, :S].astype(compute_dtype)                    # [Hp, S]
    w1a_t = w1_t[:, S:].astype(compute_dtype)                    # [Hp, A]
    b1_col = jnp.pad(b1, ((0, Hp - H), (0, 0)))                  # [Hp, 1] f32
    w2_8 = jnp.tile(jnp.pad(w2, ((0, 0), (0, Hp - H))),
                    (8, 1)).astype(compute_dtype)                # [8, Hp]

    # Feature-major activations (one-time XLA transpose; avoidable if the
    # caller already stores batch along the minor axis).
    state_t = jnp.transpose(state).astype(compute_dtype)         # [S, B]
    action_t = jnp.transpose(action).astype(compute_dtype)       # [A, B]

    # Batch tile along the lane axis: a multiple of 128 (or the full batch
    # when B <= 128).  For B that fits in one tile, split into >= 2 grid steps
    # so both v7x TensorCores get work; cap at tb_max to bound VMEM.
    if B <= 128:
        TB = B
    else:
        TB = min(tb_max, _round_up(pl.cdiv(B, 2), 128))
    grid = (pl.cdiv(B, TB),)

    out8 = pl.pallas_call(
        _reward_mlp_kernel,
        out_shape=jax.ShapeDtypeStruct((8, B), jnp.float32),
        grid_spec=pltpu.PrefetchScalarGridSpec(
            num_scalar_prefetch=0,
            grid=grid,
            in_specs=[
                pl.BlockSpec((S, TB), lambda i: (0, i)),   # state^T  (blocked)
                pl.BlockSpec((A, TB), lambda i: (0, i)),   # action^T (blocked)
                pl.BlockSpec((Hp, S), lambda i: (0, 0)),   # w1 state rows
                pl.BlockSpec((Hp, A), lambda i: (0, 0)),   # w1 action rows
                pl.BlockSpec((Hp, 1), lambda i: (0, 0)),   # b1 column
                pl.BlockSpec((8, Hp), lambda i: (0, 0)),   # w2 row x8
                pl.BlockSpec(memory_space=pltpu.MemorySpace.SMEM),  # b2 scalar
            ],
            out_specs=pl.BlockSpec((8, TB), lambda i: (0, i)),
        ),
        compiler_params=pltpu.CompilerParams(
            dimension_semantics=("parallel",),     # megacore split on v7x
            vmem_limit_bytes=48 * 1024 * 1024,     # covers TB=8192 footprint
        ),
    )(state_t, action_t, w1s_t, w1a_t, b1_col, w2_8, b2)

    # Row 0 of the replicated output -> [B, 1] (tiny XLA op).
    return out8[0].reshape(B, 1)


def init_params(key, state_dim, action_dim, hidden_dim=64):
    """Deterministic synthetic init mimicking nn.Linear's U(-1/sqrt(fan_in), +)."""
    d_in = state_dim + action_dim
    k1, k2, k3, k4 = jax.random.split(key, 4)
    lim1 = 1.0 / jnp.sqrt(jnp.float32(d_in))
    lim2 = 1.0 / jnp.sqrt(jnp.float32(hidden_dim))
    w1 = jax.random.uniform(k1, (d_in, hidden_dim), jnp.float32, -lim1, lim1)
    b1 = jax.random.uniform(k2, (hidden_dim,), jnp.float32, -lim1, lim1)
    w2 = jax.random.uniform(k3, (hidden_dim, 1), jnp.float32, -lim2, lim2)
    b2 = jax.random.uniform(k4, (1,), jnp.float32, -lim2, lim2)
    return w1, b1, w2, b2


def _reference(state, action, w1, b1, w2, b2):
    x = jnp.concatenate([state, action], axis=1)
    h = jnp.maximum(x @ w1 + b1.reshape(1, -1), 0.0)
    return h @ w2 + b2.reshape(1, 1)


if __name__ == "__main__":
    # Small shapes consistent with the module's forward signature.
    batch, state_dim, action_dim, hidden_dim = 8, 16, 8, 64

    key = jax.random.PRNGKey(0)
    k_s, k_a, k_p = jax.random.split(key, 3)
    state = jax.random.normal(k_s, (batch, state_dim), jnp.float32)
    action = jax.random.normal(k_a, (batch, action_dim), jnp.float32)
    w1, b1, w2, b2 = init_params(k_p, state_dim, action_dim, hidden_dim)

    out = irl_reward(state, action, w1, b1, w2, b2)
    jax.block_until_ready(out)
    ref = _reference(state, action, w1, b1, w2, b2)
    assert out.shape == (batch, 1)
    assert jnp.allclose(out, ref, atol=1e-5, rtol=1e-5)

    # B < 8 edge case (single block smaller than a sublane tile).
    s5, a5 = state[:5], action[:5]
    out5 = irl_reward(s5, a5, w1, b1, w2, b2)
    jax.block_until_ready(out5)
    assert out5.shape == (5, 1)
    assert jnp.allclose(out5, _reference(s5, a5, w1, b1, w2, b2),
                        atol=1e-5, rtol=1e-5)

    # Multi-step grid with a ragged last batch tile (pipelined path; also the
    # regime where the kernel is actually worth its fixed overhead).
    big_b = 4100
    kb_s, kb_a = jax.random.split(jax.random.PRNGKey(1), 2)
    b_state = jax.random.normal(kb_s, (big_b, state_dim), jnp.float32)
    b_action = jax.random.normal(kb_a, (big_b, action_dim), jnp.float32)
    b_out = irl_reward(b_state, b_action, w1, b1, w2, b2)
    jax.block_until_ready(b_out)
    b_ref = _reference(b_state, b_action, w1, b1, w2, b2)
    assert b_out.shape == (big_b, 1)
    assert jnp.allclose(b_out, b_ref, atol=1e-4, rtol=1e-4)

    print("KERNEL_OK")
</pallas_src>

<mosaic_0001>
module attributes {stable_mosaic.version = 11 : i64} {
  func.func @_reward_mlp_kernel(%arg0: i32, %arg1: memref<16x8xf32, #tpu.memory_space<vmem>>, %arg2: memref<8x8xf32, #tpu.memory_space<vmem>>, %arg3: memref<128x16xf32, #tpu.memory_space<vmem>>, %arg4: memref<128x8xf32, #tpu.memory_space<vmem>>, %arg5: memref<128x1xf32, #tpu.memory_space<vmem>>, %arg6: memref<8x128xf32, #tpu.memory_space<vmem>>, %arg7: memref<1x1xf32, #tpu.memory_space<smem>>, %arg8: memref<8x8xf32, #tpu.memory_space<vmem>>) attributes {dimension_semantics = [#tpu.dimension_semantics<parallel>], iteration_bounds = array<i64: 1>, scalar_prefetch = 0 : i64, scratch_operands = 0 : i64, tpu.core_type = #tpu.core_type<tc>, window_params = [{transform_indices = @transform_0, window_bounds = array<i64: 16, 8>}, {transform_indices = @transform_1, window_bounds = array<i64: 8, 8>}, {pipeline_mode = #tpu.pipeline_mode<synchronous>, transform_indices = @transform_2, window_bounds = array<i64: 128, 16>}, {pipeline_mode = #tpu.pipeline_mode<synchronous>, transform_indices = @transform_3, window_bounds = array<i64: 128, 8>}, {pipeline_mode = #tpu.pipeline_mode<synchronous>, transform_indices = @transform_4, window_bounds = array<i64: 128, 1>}, {pipeline_mode = #tpu.pipeline_mode<synchronous>, transform_indices = @transform_5, window_bounds = array<i64: 8, 128>}, {transform_indices = @transform_6, window_bounds = array<i64: 1, 1>}, {transform_indices = @transform_7, window_bounds = array<i64: 8, 8>}]} {
    %c0 = arith.constant 0 : index
    %c0_0 = arith.constant 0 : index
    %0 = vector.load %arg3[%c0, %c0_0] : memref<128x16xf32, #tpu.memory_space<vmem>>, vector<128x16xf32>
    %c0_1 = arith.constant 0 : index
    %c0_2 = arith.constant 0 : index
    %1 = vector.load %arg1[%c0_1, %c0_2] : memref<16x8xf32, #tpu.memory_space<vmem>>, vector<16x8xf32>
    %cst = arith.constant dense<0.000000e+00> : vector<128x8xf32>
    %2 = tpu.matmul %0, %1, %cst {dimension_numbers = #tpu.dot_dimension_numbers<[1], [0], [0], [1], [0, 0, 1, 1], [], []>} : vector<128x16xf32>, vector<16x8xf32>, vector<128x8xf32> -> vector<128x8xf32>
    %c0_3 = arith.constant 0 : index
    %c0_4 = arith.constant 0 : index
    %3 = vector.load %arg4[%c0_3, %c0_4] : memref<128x8xf32, #tpu.memory_space<vmem>>, vector<128x8xf32>
    %c0_5 = arith.constant 0 : index
    %c0_6 = arith.constant 0 : index
    %4 = vector.load %arg2[%c0_5, %c0_6] : memref<8x8xf32, #tpu.memory_space<vmem>>, vector<8x8xf32>
    %cst_7 = arith.constant dense<0.000000e+00> : vector<128x8xf32>
    %5 = tpu.matmul %3, %4, %cst_7 {dimension_numbers = #tpu.dot_dimension_numbers<[1], [0], [0], [1], [0, 0, 1, 1], [], []>} : vector<128x8xf32>, vector<8x8xf32>, vector<128x8xf32> -> vector<128x8xf32>
    %6 = arith.addf %2, %5 : vector<128x8xf32>
    %c0_8 = arith.constant 0 : index
    %c0_9 = arith.constant 0 : index
    %7 = vector.load %arg5[%c0_8, %c0_9] : memref<128x1xf32, #tpu.memory_space<vmem>>, vector<128x1xf32>
    %8 = vector.broadcast %7 : vector<128x1xf32> to vector<128x8xf32>
    %9 = arith.addf %6, %8 : vector<128x8xf32>
    %cst_10 = arith.constant 0.000000e+00 : f32
    %10 = vector.broadcast %cst_10 : f32 to vector<128x8xf32>
    %11 = arith.maximumf %9, %10 : vector<128x8xf32>
    %c0_11 = arith.constant 0 : index
    %c0_12 = arith.constant 0 : index
    %12 = vector.load %arg6[%c0_11, %c0_12] : memref<8x128xf32, #tpu.memory_space<vmem>>, vector<8x128xf32>
    %cst_13 = arith.constant dense<0.000000e+00> : vector<8x8xf32>
    %13 = tpu.matmul %12, %11, %cst_13 {dimension_numbers = #tpu.dot_dimension_numbers<[1], [0], [0], [1], [0, 0, 1, 1], [], []>} : vector<8x128xf32>, vector<128x8xf32>, vector<8x8xf32> -> vector<8x8xf32>
    %c0_14 = arith.constant 0 : index
    %c0_15 = arith.constant 0 : index
    %14 = memref.load %arg7[%c0_14, %c0_15] : memref<1x1xf32, #tpu.memory_space<smem>>
    %15 = vector.broadcast %14 : f32 to vector<8x8xf32>
    %16 = arith.addf %13, %15 : vector<8x8xf32>
    %c0_16 = arith.constant 0 : index
    %c0_17 = arith.constant 0 : index
    %17 = vector.load %arg8[%c0_16, %c0_17] : memref<8x8xf32, #tpu.memory_space<vmem>>, vector<8x8xf32>
    tpu.vector_store %arg8[%c0_16, %c0_17], %16 {strides = array<i32>} : memref<8x8xf32, #tpu.memory_space<vmem>>, vector<8x8xf32>,
    return
  }
  func.func @transform_0(%arg0: i32) -> (i32, i32) {
    %c0_i32 = arith.constant 0 : i32
    %c0_i32_0 = arith.constant 0 : i32
    return %c0_i32, %arg0 : i32, i32
  }
  func.func @transform_1(%arg0: i32) -> (i32, i32) {
    %c0_i32 = arith.constant 0 : i32
    %c0_i32_0 = arith.constant 0 : i32
    return %c0_i32, %arg0 : i32, i32
  }
  func.func @transform_2(%arg0: i32) -> (i32, i32) {
    %c0_i32 = arith.constant 0 : i32
    %c0_i32_0 = arith.constant 0 : i32
    %c0_i32_1 = arith.constant 0 : i32
    return %c0_i32, %c0_i32_0 : i32, i32
  }
  func.func @transform_3(%arg0: i32) -> (i32, i32) {
    %c0_i32 = arith.constant 0 : i32
    %c0_i32_0 = arith.constant 0 : i32
    %c0_i32_1 = arith.constant 0 : i32
    return %c0_i32, %c0_i32_0 : i32, i32
  }
  func.func @transform_4(%arg0: i32) -> (i32, i32) {
    %c0_i32 = arith.constant 0 : i32
    %c0_i32_0 = arith.constant 0 : i32
    %c0_i32_1 = arith.constant 0 : i32
    return %c0_i32, %c0_i32_0 : i32, i32
  }
  func.func @transform_5(%arg0: i32) -> (i32, i32) {
    %c0_i32 = arith.constant 0 : i32
    %c0_i32_0 = arith.constant 0 : i32
    %c0_i32_1 = arith.constant 0 : i32
    return %c0_i32, %c0_i32_0 : i32, i32
  }
  func.func @transform_6(%arg0: i32) -> (i32, i32) {
    %c0_i32 = arith.constant 0 : i32
    %c0_i32_0 = arith.constant 0 : i32
    %c0_i32_1 = arith.constant 0 : i32
    return %c0_i32, %c0_i32_0 : i32, i32
  }
  func.func @transform_7(%arg0: i32) -> (i32, i32) {
    %c0_i32 = arith.constant 0 : i32
    %c0_i32_0 = arith.constant 0 : i32
    return %c0_i32, %arg0 : i32, i32
  }
}

</mosaic_0001>

<bundles_post_ra>
// kernel: tpu_custom_call.1
= control target key start
LH: loop header
LB: loop body
LE: loop exit
PB: predicated region body
PF: predicated region fallthrough
CT: control target
= control target key end

     0   :  { %v525_v3 = vmov 0   ;;  %vm63_vm0 = vcmask 64512   ;;  %vm177_vm1 = vcmask 130048   ;;  %s780_s0 = inlined_call_operand.vmem [shape: f32[16,8], index: 0, kind: input, shape index: {}]   ;;  %s781_s1 = inlined_call_operand.vmem [shape: f32[8,8], index: 1, kind: input, shape index: {}]   ;;  %s782_s2 = inlined_call_operand.vmem [shape: f32[128,16], index: 2, kind: input, shape index: {}]   ;;  %s783_s3 = inlined_call_operand.vmem [shape: f32[128,8], index: 3, kind: input, shape index: {}]   ;;  %s784_s4 = inlined_call_operand.vmem [shape: f32[128,1], index: 4, kind: input, shape index: {}]   ;;  %s785_s5 = inlined_call_operand.vmem [shape: f32[8,128], index: 5, kind: input, shape index: {}]   ;;  %s786_s6 = inlined_call_operand.<no memory space> [shape: f32[1,1], index: 6, kind: input, shape index: {}]   ;;  %s787_s7 = inlined_call_operand.hbm [shape: f32[8,8], index: 7, kind: output, shape index: {}]  }
   0x1   :  { %v45_v0 = vld [vmem:[%s780_s0 + $0x8] sm:$0xff]  ;;  %v306_v1 = vld [vmem:[%s784_s4 + $0x78] sm:$0xff]  ;;  %v62_v2 = vld [vmem:[%s781_s1] sm:$0xff]  ;;  %496 = vset.pattern.permute.xlu0 %v525_v3  ;;  %497 = vset.pattern.permute.xlu1 %v525_v3 }
   0x2   :  { %240 = vmatpush.msra.mxu1 %v45_v0  ;;  %v44_v4 = vld [vmem:[%s780_s0] sm:$0xff]  ;;  %492 = vmatpush.msra.mxu3 %v45_v0  ;;  %v55_v6 = vld [vmem:[%s783_s3 + $0x48] sm:$0xff]  ;;  %v305_v10 = vld [vmem:[%s784_s4 + $0x70] sm:$0xff] }
   0x3   :  { %384 = vperm.xlu0 %496, %v306_v1   ;;  %v46_v5 = vld [vmem:[%s783_s3] sm:$0xff]  ;;  %127 = vmatpush.msra.mxu0 %v62_v2  ;;  %v37_v8 = vld [vmem:[%s782_s2 + $0x48] sm:$0xff]  ;;  %v302_v11 = vld [vmem:[%s784_s4 + $0x58] sm:$0xff] }
   0x4   :  { %491 = vmatpush.msra.mxu2 %v62_v2  ;;  %v28_v7 = vld [vmem:[%s782_s2] sm:$0xff]  ;;  %241 = vmatpush.msra.mxu1 %v44_v4  ;;  %v304_v9 = vld [vmem:[%s784_s4 + $0x68] sm:$0xff]  ;;  %v56_v13 = vld [vmem:[%s783_s3 + $0x50] sm:$0xff] }
   0x5   :  { %493 = vmatpush.msra.mxu3 %v44_v4  ;;  %459 = vmatmul.msk.f32.vlgmr.msra.gmra.mxu0 %vm63_vm0, %v46_v5  ;;  %v47_v12 = vld [vmem:[%s783_s3 + $0x8] sm:$0xff]  ;;  %v38_v15 = vld [vmem:[%s782_s2 + $0x50] sm:$0xff] }
   0x6   :  { %468 = vmatmul.msk.f32.vlgmr.msra.gmra.mxu2 %vm63_vm0, %v55_v6  ;;  %475 = vmatmul.msk.f32.vlgmr.msra.gmra.mxu1 %vm177_vm1, %v28_v7  ;;  %v29_v14 = vld [vmem:[%s782_s2 + $0x8] sm:$0xff] }
   0x7   :  { %484 = vmatmul.msk.f32.vlgmr.msra.gmra.mxu3 %vm177_vm1, %v37_v8  ;;  %498 = vset.pattern.permute.xlu2 %v525_v3 }
   0x8   :  { %374 = vperm.xlu1 %497, %v304_v9   ;;  %364 = vperm.xlu2 %498, %v302_v11  }
   0xb   :  { %379 = vperm.xlu0 %496, %v305_v10  }
   0xc   :  { %13 = vsyncpa [#allocation4], 0  ;;  %v303_v16 = vld [vmem:[%s784_s4 + $0x60] sm:$0xff]  ;;  %v301_v17 = vld [vmem:[%s784_s4 + $0x50] sm:$0xff]  ;;  %s526_s27 = smov [#allocation3]   ;;  %s450_s8 = sshll.u32 %s787_s7, 4  ;;  %s451_s8 = int_to_ptr.hbm [resolvable:$true] %s450_s8 }
   0xd   :  { %460 = vmatmul.msk.f32.gmra.mxu0 %vm63_vm0, %v47_v12  ;;  %v300_v18 = vld [vmem:[%s784_s4 + $0x48] sm:$0xff]  ;;  %v48_v19 = vld [vmem:[%s783_s3 + $0x10] sm:$0xff]  ;;  %v57_v20 = vld [vmem:[%s783_s3 + $0x58] sm:$0xff]  ;;  %s448_s28 = sshll.u32 %s526_s27, 4  ;;  %s449_s28 = int_to_ptr.vmem [resolvable:$true] %s448_s28 }
   0xe   :  { %469 = vmatmul.msk.f32.gmra.mxu2 %vm63_vm0, %v56_v13  ;;  %476 = vmatmul.msk.f32.gmra.mxu1 %vm177_vm1, %v29_v14  ;;  %v30_v21 = vld [vmem:[%s782_s2 + $0x10] sm:$0xff]  ;;  %v39_v22 = vld [vmem:[%s782_s2 + $0x58] sm:$0xff]  ;;  %v299_v23 = vld [vmem:[%s784_s4 + $0x40] sm:$0xff] }
   0xf   :  { %485 = vmatmul.msk.f32.gmra.mxu3 %vm177_vm1, %v38_v15  ;;  %v298_v24 = vld [vmem:[%s784_s4 + $0x38] sm:$0xff]  ;;  %v297_v25 = vld [vmem:[%s784_s4 + $0x30] sm:$0xff]  ;;  %v58_v27 = vld [vmem:[%s783_s3 + $0x60] sm:$0xff] }
  0x10   :  { %369 = vperm.xlu1 %497, %v303_v16   ;;  %359 = vperm.xlu2 %498, %v301_v17   ;;  %v49_v26 = vld [vmem:[%s783_s3 + $0x18] sm:$0xff]  ;;  %v40_v29 = vld [vmem:[%s782_s2 + $0x60] sm:$0xff]  ;;  %v296_v30 = vld [vmem:[%s784_s4 + $0x28] sm:$0xff] }
  0x11   :  { %v31_v28 = vld [vmem:[%s782_s2 + $0x18] sm:$0xff]  ;;  %v295_v31 = vld [vmem:[%s784_s4 + $0x20] sm:$0xff]  ;;  %v59_v34 = vld [vmem:[%s783_s3 + $0x68] sm:$0xff] }
  0x12   :  { %v294_v32 = vld [vmem:[%s784_s4 + $0x18] sm:$0xff]  ;;  %v50_v33 = vld [vmem:[%s783_s3 + $0x20] sm:$0xff]  ;;  %v41_v36 = vld [vmem:[%s782_s2 + $0x68] sm:$0xff] }
  0x13   :  { %354 = vperm.xlu0 %496, %v300_v18   ;;  %v32_v35 = vld [vmem:[%s782_s2 + $0x20] sm:$0xff]  ;;  %v293_v37 = vld [vmem:[%s784_s4 + $0x10] sm:$0xff]  ;;  %v292_v38 = vld [vmem:[%s784_s4 + $0x8] sm:$0xff] }
  0x14   :  { %v291_v39 = vld [vmem:[%s784_s4] sm:$0xff]  ;;  %v51_v40 = vld [vmem:[%s783_s3 + $0x28] sm:$0xff]  ;;  %v60_v41 = vld [vmem:[%s783_s3 + $0x70] sm:$0xff] }
  0x15   :  { %461 = vmatmul.msk.f32.gmra.mxu0 %vm63_vm0, %v48_v19  ;;  %v33_v42 = vld [vmem:[%s782_s2 + $0x28] sm:$0xff]  ;;  %v42_v43 = vld [vmem:[%s782_s2 + $0x70] sm:$0xff]  ;;  %v61_v45 = vld [vmem:[%s783_s3 + $0x78] sm:$0xff] }
  0x16   :  { %470 = vmatmul.msk.f32.gmra.mxu2 %vm63_vm0, %v57_v20  ;;  %477 = vmatmul.msk.f32.gmra.mxu1 %vm177_vm1, %v30_v21  ;;  %v52_v44 = vld [vmem:[%s783_s3 + $0x30] sm:$0xff]  ;;  %v43_v47 = vld [vmem:[%s782_s2 + $0x78] sm:$0xff]  ;;  %v54_v50 = vld [vmem:[%s783_s3 + $0x40] sm:$0xff] }
  0x17   :  { %486 = vmatmul.msk.f32.gmra.mxu3 %vm177_vm1, %v39_v22  ;;  %v34_v46 = vld [vmem:[%s782_s2 + $0x30] sm:$0xff]  ;;  %v53_v48 = vld [vmem:[%s783_s3 + $0x38] sm:$0xff]  ;;  %v36_v51 = vld [vmem:[%s782_s2 + $0x40] sm:$0xff] }
  0x18   :  { %349 = vperm.xlu1 %497, %v299_v23   ;;  %344 = vperm.xlu2 %498, %v298_v24   ;;  %v35_v49 = vld [vmem:[%s782_s2 + $0x38] sm:$0xff] }
  0x1b   :  { %339 = vperm.xlu0 %496, %v297_v25  }
  0x1d   :  { %462 = vmatmul.msk.f32.gmra.mxu0 %vm63_vm0, %v49_v26 }
  0x1e   :  { %471 = vmatmul.msk.f32.gmra.mxu2 %vm63_vm0, %v58_v27  ;;  %478 = vmatmul.msk.f32.gmra.mxu1 %vm177_vm1, %v31_v28 }
  0x1f   :  { %487 = vmatmul.msk.f32.gmra.mxu3 %vm177_vm1, %v40_v29 }
  0x20   :  { %334 = vperm.xlu1 %497, %v296_v30   ;;  %329 = vperm.xlu2 %498, %v295_v31  }
  0x23   :  { %324 = vperm.xlu0 %496, %v294_v32  }
  0x25   :  { %463 = vmatmul.msk.f32.gmra.mxu0 %vm63_vm0, %v50_v33 }
  0x26   :  { %472 = vmatmul.msk.f32.gmra.mxu2 %vm63_vm0, %v59_v34  ;;  %479 = vmatmul.msk.f32.gmra.mxu1 %vm177_vm1, %v32_v35 }
  0x27   :  { %488 = vmatmul.msk.f32.gmra.mxu3 %vm177_vm1, %v41_v36 }
  0x28   :  { %319 = vperm.xlu1 %497, %v293_v37   ;;  %314 = vperm.xlu2 %498, %v292_v38  }
  0x2b   :  { %309 = vperm.xlu0 %496, %v291_v39  }
  0x2d   :  { %464 = vmatmul.msk.f32.gmra.mxu0 %vm63_vm0, %v51_v40 }
  0x2e   :  { %473 = vmatmul.msk.f32.gmra.mxu2 %vm63_vm0, %v60_v41  ;;  %480 = vmatmul.msk.f32.gmra.mxu1 %vm177_vm1, %v33_v42 }
  0x2f   :  { %489 = vmatmul.msk.f32.gmra.mxu3 %vm177_vm1, %v42_v43 }
  0x35   :  { %465 = vmatmul.msk.f32.gmra.mxu0 %vm63_vm0, %v52_v44 }
  0x36   :  { %474 = vmatmul.msk.f32.gmra.mxu2 %vm63_vm0, %v61_v45  ;;  %481 = vmatmul.msk.f32.gmra.mxu1 %vm177_vm1, %v34_v46 }
  0x37   :  { %490 = vmatmul.msk.f32.gmra.mxu3 %vm177_vm1, %v43_v47 }
  0x3d   :  { %466 = vmatmul.msk.f32.gmra.mxu0 %vm63_vm0, %v53_v48 }
  0x3e   :  { %482 = vmatmul.msk.f32.gmra.mxu1 %vm177_vm1, %v35_v49 }
  0x45   :  { %467 = vmatmul.msk.f32.gmra.mxu0 %vm63_vm0, %v54_v50 }
  0x46   :  { %483 = vmatmul.msk.f32.gmra.mxu1 %vm177_vm1, %v36_v51 }
  0x62   :  { %v365_v13 = vpop.permute.xlu2 %364 }
  0x6a   :  { %v360_v21 = vpop.permute.xlu2 %359 }
  0x72   :  { %v345_v37 = vpop.permute.xlu2 %344 }
  0x75   :  { %v385_v7 = vpop.permute.xlu0 %384 }
  0x7a   :  { %v375_v10 = vpop.permute.xlu1 %374 }
  0x7d   :  { %v380_v15 = vpop.permute.xlu0 %379 }
  0x82   :  { %v129_v52 = vpop.f32.mrf.mxu0  ;;  %v370_v19 = vpop.permute.xlu1 %369 }
  0x83   :  { %v243_v53 = vpop.f32.mrf.mxu1 }
  0x84   :  { %v752_v54 = vadd.f32 %v243_v53, %v129_v52 }
  0x85   :  { %v355_v22 = vpop.permute.xlu0 %354 }
  0x89   :  { %v156_v55 = vpop.f32.mrf.mxu2 }
  0x8a   :  { %v270_v56 = vpop.f32.mrf.mxu3  ;;  %v132_v57 = vpop.f32.mrf.mxu0 }
  0x8b   :  { %v246_v58 = vpop.f32.mrf.mxu1  ;;  %v350_v33 = vpop.permute.xlu1 %349  ;;  %v271_v42 = vadd.f32 %v270_v56, %v156_v55 }
  0x8c   :  { %v754_v59 = vadd.f32 %v246_v58, %v132_v57 }
  0x8d   :  { %v340_v41 = vpop.permute.xlu0 %339  ;;  %v396_v52 = vadd.f32 %v355_v22, %v271_v42  ;;  %v419_v22 = vld [vmem:[%s785_s5] sm:$0xff] }
  0x8f   :  { %v412_v56 = vmax.f32 %v396_v52, 0.0 }
  0x91   :  { %v159_v60 = vpop.f32.mrf.mxu2 }
  0x92   :  { %v273_v61 = vpop.f32.mrf.mxu3  ;;  %v756_v62 = vpop.f32.mrf.mxu0 }
  0x93   :  { %v758_v63 = vpop.f32.mrf.mxu1  ;;  %v274_v38 = vadd.f32 %v273_v61, %v159_v60  ;;  %v335_v53 = vpop.permute.xlu1 %334 }
  0x94   :  { %v330_v61 = vpop.permute.xlu2 %329 }
  0x95   :  { %v397_v49 = vadd.f32 %v360_v21, %v274_v38 }
  0x97   :  { %v413_v58 = vmax.f32 %v397_v49, 0.0 }
  0x99   :  { %v162_v0 = vpop.f32.mrf.mxu2 }
  0x9a   :  { %v276_v1 = vpop.f32.mrf.mxu3  ;;  %v760_v2 = vpop.f32.mrf.mxu0 }
  0x9b   :  { %v762_v3 = vpop.f32.mrf.mxu1  ;;  %v277_v34 = vadd.f32 %v276_v1, %v162_v0  ;;  %v325_v1 = vpop.permute.xlu0 %324 }
  0x9d   :  { %v398_v45 = vadd.f32 %v365_v13, %v277_v34  ;;  %v250_v13 = vadd.f32 %v758_v63, %v756_v62 }
  0x9f   :  { %v414_v51 = vmax.f32 %v398_v45, 0.0 }
  0xa1   :  { %v165_v4 = vpop.f32.mrf.mxu2 }
  0xa2   :  { %v279_v5 = vpop.f32.mrf.mxu3  ;;  %v141_v6 = vpop.f32.mrf.mxu0 }
  0xa3   :  { %v255_v8 = vpop.f32.mrf.mxu1  ;;  %v280_v30 = vadd.f32 %v279_v5, %v165_v4 }
  0xa4   :  { %v256_v4 = vadd.f32 %v255_v8, %v141_v6  ;;  %v315_v6 = vpop.permute.xlu2 %314 }
  0xa5   :  { %v399_v40 = vadd.f32 %v370_v19, %v280_v30  ;;  %v310_v19 = vpop.permute.xlu0 %309 }
  0xa7   :  { %v415_v48 = vmax.f32 %v399_v40, 0.0 }
  0xa9   :  { %v168_v9 = vpop.f32.mrf.mxu2 }
  0xaa   :  { %v282_v11 = vpop.f32.mrf.mxu3  ;;  %v144_v12 = vpop.f32.mrf.mxu0 }
  0xab   :  { %v258_v14 = vpop.f32.mrf.mxu1  ;;  %v283_v26 = vadd.f32 %v282_v11, %v168_v9  ;;  %v253_v9 = vadd.f32 %v762_v3, %v760_v2  ;;  %v388_v2 = vadd.f32 %v315_v6, %v754_v59  ;;  %v421_v59 = vstv %s786_s6 }
  0xac   :  { %v259_v55 = vadd.f32 %v258_v14, %v144_v12  ;;  %v391_v12 = vadd.f32 %v330_v61, %v256_v4  ;;  %v320_v14 = vpop.permute.xlu1 %319 }
  0xad   :  { %v400_v36 = vadd.f32 %v375_v10, %v283_v26  ;;  %v389_v8 = vadd.f32 %v320_v14, %v250_v13  ;;  %v404_v62 = vmax.f32 %v388_v2, 0.0 }
  0xae   :  { %v392_v11 = vadd.f32 %v335_v53, %v259_v55 }
  0xaf   :  { %v416_v44 = vmax.f32 %v400_v36, 0.0  ;;  %v405_v21 = vmax.f32 %v389_v8, 0.0 }
  0xb1   :  { %v171_v16 = vpop.f32.mrf.mxu2 }
  0xb2   :  { %v285_v17 = vpop.f32.mrf.mxu3  ;;  %v147_v18 = vpop.f32.mrf.mxu0 }
  0xb3   :  { %v261_v20 = vpop.f32.mrf.mxu1  ;;  %v286_v23 = vadd.f32 %v285_v17, %v171_v16  ;;  %v408_v16 = vmax.f32 %v392_v11, 0.0  ;;  %v390_v17 = vadd.f32 %v325_v1, %v253_v9 }
  0xb4   :  { %v262_v57 = vadd.f32 %v261_v20, %v147_v18  ;;  %v407_v18 = vmax.f32 %v391_v12, 0.0  ;;  %v387_v20 = vadd.f32 %v310_v19, %v752_v54 }
  0xb5   :  { %v401_v32 = vadd.f32 %v380_v15, %v286_v23  ;;  %v406_v3 = vmax.f32 %v390_v17, 0.0 }
  0xb6   :  { %v403_v63 = vmax.f32 %v387_v20, 0.0 }
  0xb7   :  { %v417_v39 = vmax.f32 %v401_v32, 0.0 }
  0xb9   :  { %v174_v24 = vpop.f32.mrf.mxu2 }
  0xba   :  { %v288_v25 = vpop.f32.mrf.mxu3  ;;  %v150_v28 = vpop.f32.mrf.mxu0 }
  0xbb   :  { %v289_v27 = vadd.f32 %v288_v25, %v174_v24  ;;  %v264_v29 = vpop.f32.mrf.mxu1 }
  0xbc   :  { %v265_v50 = vadd.f32 %v264_v29, %v150_v28 }
  0xbd   :  { %v402_v31 = vadd.f32 %v385_v7, %v289_v27  ;;  %v393_v7 = vadd.f32 %v340_v41, %v262_v57 }
  0xbe   :  { %v394_v0 = vadd.f32 %v345_v37, %v265_v50 }
  0xbf   :  { %v418_v35 = vmax.f32 %v402_v31, 0.0  ;;  %v409_v15 = vmax.f32 %v393_v7, 0.0 }
  0xc0   :  { %v410_v10 = vmax.f32 %v394_v0, 0.0 }
  0xc1   :  { %422 = vmatpush.msrb.mxu2 %v418_v35 }
  0xc2   :  { %v153_v43 = vpop.f32.mrf.mxu0 }
  0xc3   :  { %423 = vmatpush.msrb.mxu2 %v417_v39  ;;  %v267_v46 = vpop.f32.mrf.mxu1 }
  0xc4   :  { %v268_v47 = vadd.f32 %v267_v46, %v153_v43 }
  0xc5   :  { %424 = vmatpush.msrb.mxu2 %v416_v44 }
  0xc6   :  { %v395_v60 = vadd.f32 %v350_v33, %v268_v47 }
  0xc7   :  { %425 = vmatpush.msrb.mxu2 %v415_v48 }
  0xc8   :  { %v411_v5 = vmax.f32 %v395_v60, 0.0 }
  0xc9   :  { %426 = vmatpush.msrb.mxu2 %v414_v51 }
  0xcb   :  { %427 = vmatpush.msrb.mxu2 %v413_v58 }
  0xcd   :  { %428 = vmatpush.msrb.mxu2 %v412_v56 }
  0xcf   :  { %429 = vmatpush.msrb.mxu2 %v411_v5 }
  0xd1   :  { %430 = vmatpush.msrb.mxu2 %v410_v10 }
  0xd3   :  { %431 = vmatpush.msrb.mxu2 %v409_v15 }
  0xd5   :  { %432 = vmatpush.msrb.mxu2 %v408_v16 }
  0xd7   :  { %433 = vmatpush.msrb.mxu2 %v407_v18 }
  0xd9   :  { %434 = vmatpush.msrb.mxu2 %v406_v3 }
  0xdb   :  { %435 = vmatpush.msrb.mxu2 %v405_v21 }
  0xdd   :  { %436 = vmatpush.msrb.mxu2 %v404_v62 }
  0xdf   :  { %437 = vmatpush.msrb.mxu2 %v403_v63 }
  0xe0   :  { %438 = vmatmul.f32.vlgmr.msrb.gmra.mxu2 %v419_v22 }
 0x163   :  { %v439_v54 = vpop.f32.mrf.mxu2 }
 0x164   :  { %v440_v23 = vadd.f32 %v439_v54, %v421_v59 }
 0x166   :  { %442 = vst.msk [vmem:[#allocation3] sm:$0xff] %vm63_vm0, %v440_v23 }
 0x167   :  { %453 = dma.vmem_to_hbm [thread:$0]  %s449_s28, 128, %s451_s8, [#allocation4]  }
 0x168   :  { %523 = dma.done.wait [#allocation4], 128  }
 0x169   :  { %524 = vsyncadd [#allocation4], 4294967168 }
 0x16a   :  { %458 = vsyncpa [#allocation4], 1 }

</bundles_post_ra>
